<compile_context>
chip_gen: v7x
topology: tpu7x:2x2x1
jax: 0.10.0
libtpu: 0.0.40
codegen_flags: <defaults>
</compile_context>

<pallas_src>
import jax
import jax.numpy as jnp
from jax.experimental import pallas as pl
from jax.experimental.pallas import tpu as pltpu


_LANE_PAD = 8  # packed output width: 6 live columns + 2 zero-pad


def _cv6_kernel(x1_ref, x2_ref, x3_ref, x4_ref, x5_ref, x6_ref, w_ref, o_ref):
    # x*_ref: (TM, E) activations.  w_ref: (8, E) float32 weights (rows 0..5
    # are cv1..cv6, rows 6..7 are zero).  o_ref: (TM, 8); column j holds
    # cv_{j+1}(x_{j+1}) for this row tile.
    tm = o_ref.shape[0]

    # Load the tiny weight block ONCE, outside the per-linear loop.
    w = w_ref[...]                                              # (8, E) f32

    cols = jax.lax.broadcasted_iota(jnp.int32, (tm, _LANE_PAD), dimension=1)
    acc = jnp.zeros((tm, _LANE_PAD), dtype=jnp.float32)

    for j, x_ref in enumerate((x1_ref, x2_ref, x3_ref, x4_ref, x5_ref, x6_ref)):
        # f32 inputs: no cast/copy.  Sub-32-bit inputs promote into the f32
        # product (a product temp in f32 is needed for an accurate reduce).
        # TODO(synk): for bf16/int8 inputs, chunk the tile along sublanes with
        # lax.fori_loop(unroll=True) to bound the promoted live range.
        prod = x_ref[...] * w[j:j + 1, :]                       # (TM, E) f32, VPU
        s = jnp.sum(prod, axis=-1, keepdims=True)               # (TM, 1)  XLU reduce
        acc = jnp.where(cols == j, s, acc)                      # place in column j

    o_ref[...] = acc.astype(o_ref.dtype)


def _vmem_capacity_bytes():
    """Best-effort per-generation VMEM size query; conservative fallback."""
    try:
        info = pltpu.get_tpu_info()
        for attr in ("vmem_capacity_bytes", "vmem_size_bytes", "vmem_bytes"):
            v = getattr(info, attr, None)
            if v:
                return int(v)
    except Exception:
        pass
    return 64 * 1024 * 1024  # v7x-sized (smallest of the targets) => safe everywhere


def _pick_row_tile(M, E, itemsize, vmem_bytes):
    """Row-tile size: VMEM-budgeted, grid-depth-aware, sublane-aligned."""
    # dtype-dependent sublane packing multiple (f32->8, bf16->16, int8/fp8->32).
    sub = {4: 8, 2: 16, 1: 32}.get(itemsize, 8)
    m_pad = -(-M // sub) * sub

    # Per-generation budget for the double-buffered 6-input working set.
    big_vmem = vmem_bytes >= 96 * 1024 * 1024      # v5e / v6e: 128 MiB VMEM
    budget = (48 if big_vmem else 20) * 1024 * 1024
    tm_budget = max(sub, (budget // (2 * 6 * E * itemsize)) // sub * sub)

    # Grid-depth constraint: aim for >= 8 grid steps (>= 4 per TC on v7x) so
    # the double-buffered pipeline overlaps DMA with compute and both v7x
    # TensorCores get work.  Falls back to the minimal tile for tiny M.
    min_steps = 8
    tm_depth = max(sub, (m_pad // min_steps) // sub * sub)

    tm = min(tm_budget, tm_depth, 4096, m_pad)
    return int(max(sub, tm)), big_vmem


def context_vector_6_forward(xs, ws, *, packed=False):
    """xs: list of 6 arrays (B, S, E); ws: list of 6 arrays (1, E).

    Returns a tuple of 6 arrays (B, S, 1) matching the torch module, or the
    packed (B, S, 6) array (column j = cv_{j+1}(x_{j+1})) if packed=True.
    """
    assert len(xs) == 6 and len(ws) == 6
    B, S, E = xs[0].shape
    M = B * S
    dtype = xs[0].dtype
    itemsize = jnp.dtype(dtype).itemsize

    # Free (metadata-only) reshape: (B, S, E) -> (M, E).
    xs_flat = [x.reshape(M, E) for x in xs]

    # Weights stay in float32 (do NOT truncate to activation dtype); pack the
    # six (1, E) rows into one sublane-aligned (8, E) block.
    w8 = jnp.concatenate(
        [w.astype(jnp.float32).reshape(1, E) for w in ws]
        + [jnp.zeros((_LANE_PAD - 6, E), dtype=jnp.float32)],
        axis=0,
    )

    vmem_bytes = _vmem_capacity_bytes()
    tm, big_vmem = _pick_row_tile(M, E, itemsize, vmem_bytes)
    grid = (pl.cdiv(M, tm),)

    x_spec = pl.BlockSpec((tm, E), lambda i: (i, 0))
    # Constant block index (0, 0) every step -> block stays resident, no
    # per-step re-fetch of the (tiny) weight block.
    w_spec = pl.BlockSpec((_LANE_PAD, E), lambda i: (0, 0))
    o_spec = pl.BlockSpec((tm, _LANE_PAD), lambda i: (i, 0))

    out = pl.pallas_call(
        _cv6_kernel,
        out_shape=jax.ShapeDtypeStruct((M, _LANE_PAD), dtype),
        grid_spec=pltpu.PrefetchScalarGridSpec(
            num_scalar_prefetch=0,
            grid=grid,
            in_specs=[x_spec] * 6 + [w_spec],
            out_specs=o_spec,
        ),
        compiler_params=pltpu.CompilerParams(
            dimension_semantics=("parallel",),
            vmem_limit_bytes=(96 if big_vmem else 48) * 1024 * 1024,
        ),
        cost_estimate=pl.CostEstimate(
            flops=2 * 6 * M * E,
            transcendentals=0,
            bytes_accessed=(6 * M * E + M * _LANE_PAD) * itemsize
            + _LANE_PAD * E * 4,
        ),
    )(*xs_flat, w8)

    packed_out = out[:, :6].reshape(B, S, 6)
    if packed:
        # Packed layout avoids six strided output slices for callers that can
        # consume it directly.
        return packed_out
    return tuple(packed_out[..., j:j + 1] for j in range(6))


if __name__ == "__main__":
    # Small shapes consistent with the module: batch=2, seq=8, embed_dim=128.
    B, S, E = 2, 8, 128
    key = jax.random.PRNGKey(0)
    keys = jax.random.split(key, 12)

    xs = [jax.random.normal(keys[i], (B, S, E), dtype=jnp.float32)
          for i in range(6)]
    # nn.Linear(embed_dim, 1, bias=False): weight shape (1, embed_dim).
    ws = [jax.random.normal(keys[6 + i], (1, E), dtype=jnp.float32)
          * (1.0 / jnp.sqrt(E)) for i in range(6)]

    outs = jax.block_until_ready(context_vector_6_forward(xs, ws))

    # Reference check in plain JAX (x @ w.T == elementwise multiply + reduce).
    for i in range(6):
        ref = jnp.sum(xs[i] * ws[i], axis=-1, keepdims=True)   # (B, S, 1)
        assert outs[i].shape == (B, S, 1), f"bad shape for cv{i + 1}"
        assert jnp.allclose(outs[i], ref, atol=1e-4, rtol=1e-4), \
            f"mismatch cv{i + 1}"

    print("KERNEL_OK")
</pallas_src>

<mosaic_0001>
module attributes {stable_mosaic.version = 11 : i64} {
  func.func @_cv6_kernel(%arg0: i32, %arg1: memref<8x128xf32, #tpu.memory_space<vmem>>, %arg2: memref<8x128xf32, #tpu.memory_space<vmem>>, %arg3: memref<8x128xf32, #tpu.memory_space<vmem>>, %arg4: memref<8x128xf32, #tpu.memory_space<vmem>>, %arg5: memref<8x128xf32, #tpu.memory_space<vmem>>, %arg6: memref<8x128xf32, #tpu.memory_space<vmem>>, %arg7: memref<8x128xf32, #tpu.memory_space<vmem>>, %arg8: memref<8x8xf32, #tpu.memory_space<vmem>>) attributes {dimension_semantics = [#tpu.dimension_semantics<parallel>], iteration_bounds = array<i64: 2>, scalar_prefetch = 0 : i64, scratch_operands = 0 : i64, tpu.core_type = #tpu.core_type<tc>, window_params = [{transform_indices = @transform_0, window_bounds = array<i64: 8, 128>}, {transform_indices = @transform_1, window_bounds = array<i64: 8, 128>}, {transform_indices = @transform_2, window_bounds = array<i64: 8, 128>}, {transform_indices = @transform_3, window_bounds = array<i64: 8, 128>}, {transform_indices = @transform_4, window_bounds = array<i64: 8, 128>}, {transform_indices = @transform_5, window_bounds = array<i64: 8, 128>}, {pipeline_mode = #tpu.pipeline_mode<synchronous>, transform_indices = @transform_6, window_bounds = array<i64: 8, 128>}, {transform_indices = @transform_7, window_bounds = array<i64: 8, 8>}]} {
    %c0 = arith.constant 0 : index
    %c0_0 = arith.constant 0 : index
    %0 = vector.load %arg7[%c0, %c0_0] : memref<8x128xf32, #tpu.memory_space<vmem>>, vector<8x128xf32>
    %1 = tpu.iota {dimensions = array<i32: 1>} : vector<8x8xi32>
    %cst = arith.constant 0.000000e+00 : f32
    %2 = vector.broadcast %cst : f32 to vector<8x8xf32>
    %c0_1 = arith.constant 0 : index
    %c0_2 = arith.constant 0 : index
    %3 = vector.load %arg1[%c0_1, %c0_2] : memref<8x128xf32, #tpu.memory_space<vmem>>, vector<8x128xf32>
    %4 = vector.extract_strided_slice %0 {offsets = [0, 0], sizes = [1, 128], strides = [1, 1]} : vector<8x128xf32> to vector<1x128xf32>
    %5 = vector.broadcast %4 : vector<1x128xf32> to vector<8x128xf32>
    %6 = arith.mulf %3, %5 : vector<8x128xf32>
    %cst_3 = arith.constant dense<0.000000e+00> : vector<8xf32>
    %7 = vector.multi_reduction <add>, %6, %cst_3 [1] : vector<8x128xf32> to vector<8xf32>
    %8 = vector.shape_cast %7 : vector<8xf32> to vector<8x1xf32>
    %c0_i32 = arith.constant 0 : i32
    %9 = vector.broadcast %c0_i32 : i32 to vector<8x8xi32>
    %10 = arith.cmpi eq, %1, %9 : vector<8x8xi32>
    %11 = vector.shape_cast %8 : vector<8x1xf32> to vector<8x1xf32>
    %12 = vector.broadcast %11 : vector<8x1xf32> to vector<8x8xf32>
    %13 = arith.select %10, %12, %2 : vector<8x8xi1>, vector<8x8xf32>
    %c0_4 = arith.constant 0 : index
    %c0_5 = arith.constant 0 : index
    %14 = vector.load %arg2[%c0_4, %c0_5] : memref<8x128xf32, #tpu.memory_space<vmem>>, vector<8x128xf32>
    %15 = vector.extract_strided_slice %0 {offsets = [1, 0], sizes = [1, 128], strides = [1, 1]} : vector<8x128xf32> to vector<1x128xf32>
    %16 = vector.broadcast %15 : vector<1x128xf32> to vector<8x128xf32>
    %17 = arith.mulf %14, %16 : vector<8x128xf32>
    %cst_6 = arith.constant dense<0.000000e+00> : vector<8xf32>
    %18 = vector.multi_reduction <add>, %17, %cst_6 [1] : vector<8x128xf32> to vector<8xf32>
    %19 = vector.shape_cast %18 : vector<8xf32> to vector<8x1xf32>
    %c1_i32 = arith.constant 1 : i32
    %20 = vector.broadcast %c1_i32 : i32 to vector<8x8xi32>
    %21 = arith.cmpi eq, %1, %20 : vector<8x8xi32>
    %22 = vector.shape_cast %19 : vector<8x1xf32> to vector<8x1xf32>
    %23 = vector.broadcast %22 : vector<8x1xf32> to vector<8x8xf32>
    %24 = arith.select %21, %23, %13 : vector<8x8xi1>, vector<8x8xf32>
    %c0_7 = arith.constant 0 : index
    %c0_8 = arith.constant 0 : index
    %25 = vector.load %arg3[%c0_7, %c0_8] : memref<8x128xf32, #tpu.memory_space<vmem>>, vector<8x128xf32>
    %26 = vector.extract_strided_slice %0 {offsets = [2, 0], sizes = [1, 128], strides = [1, 1]} : vector<8x128xf32> to vector<1x128xf32>
    %27 = vector.broadcast %26 : vector<1x128xf32> to vector<8x128xf32>
    %28 = arith.mulf %25, %27 : vector<8x128xf32>
    %cst_9 = arith.constant dense<0.000000e+00> : vector<8xf32>
    %29 = vector.multi_reduction <add>, %28, %cst_9 [1] : vector<8x128xf32> to vector<8xf32>
    %30 = vector.shape_cast %29 : vector<8xf32> to vector<8x1xf32>
    %c2_i32 = arith.constant 2 : i32
    %31 = vector.broadcast %c2_i32 : i32 to vector<8x8xi32>
    %32 = arith.cmpi eq, %1, %31 : vector<8x8xi32>
    %33 = vector.shape_cast %30 : vector<8x1xf32> to vector<8x1xf32>
    %34 = vector.broadcast %33 : vector<8x1xf32> to vector<8x8xf32>
    %35 = arith.select %32, %34, %24 : vector<8x8xi1>, vector<8x8xf32>
    %c0_10 = arith.constant 0 : index
    %c0_11 = arith.constant 0 : index
    %36 = vector.load %arg4[%c0_10, %c0_11] : memref<8x128xf32, #tpu.memory_space<vmem>>, vector<8x128xf32>
    %37 = vector.extract_strided_slice %0 {offsets = [3, 0], sizes = [1, 128], strides = [1, 1]} : vector<8x128xf32> to vector<1x128xf32>
    %38 = vector.broadcast %37 : vector<1x128xf32> to vector<8x128xf32>
    %39 = arith.mulf %36, %38 : vector<8x128xf32>
    %cst_12 = arith.constant dense<0.000000e+00> : vector<8xf32>
    %40 = vector.multi_reduction <add>, %39, %cst_12 [1] : vector<8x128xf32> to vector<8xf32>
    %41 = vector.shape_cast %40 : vector<8xf32> to vector<8x1xf32>
    %c3_i32 = arith.constant 3 : i32
    %42 = vector.broadcast %c3_i32 : i32 to vector<8x8xi32>
    %43 = arith.cmpi eq, %1, %42 : vector<8x8xi32>
    %44 = vector.shape_cast %41 : vector<8x1xf32> to vector<8x1xf32>
    %45 = vector.broadcast %44 : vector<8x1xf32> to vector<8x8xf32>
    %46 = arith.select %43, %45, %35 : vector<8x8xi1>, vector<8x8xf32>
    %c0_13 = arith.constant 0 : index
    %c0_14 = arith.constant 0 : index
    %47 = vector.load %arg5[%c0_13, %c0_14] : memref<8x128xf32, #tpu.memory_space<vmem>>, vector<8x128xf32>
    %48 = vector.extract_strided_slice %0 {offsets = [4, 0], sizes = [1, 128], strides = [1, 1]} : vector<8x128xf32> to vector<1x128xf32>
    %49 = vector.broadcast %48 : vector<1x128xf32> to vector<8x128xf32>
    %50 = arith.mulf %47, %49 : vector<8x128xf32>
    %cst_15 = arith.constant dense<0.000000e+00> : vector<8xf32>
    %51 = vector.multi_reduction <add>, %50, %cst_15 [1] : vector<8x128xf32> to vector<8xf32>
    %52 = vector.shape_cast %51 : vector<8xf32> to vector<8x1xf32>
    %c4_i32 = arith.constant 4 : i32
    %53 = vector.broadcast %c4_i32 : i32 to vector<8x8xi32>
    %54 = arith.cmpi eq, %1, %53 : vector<8x8xi32>
    %55 = vector.shape_cast %52 : vector<8x1xf32> to vector<8x1xf32>
    %56 = vector.broadcast %55 : vector<8x1xf32> to vector<8x8xf32>
    %57 = arith.select %54, %56, %46 : vector<8x8xi1>, vector<8x8xf32>
    %c0_16 = arith.constant 0 : index
    %c0_17 = arith.constant 0 : index
    %58 = vector.load %arg6[%c0_16, %c0_17] : memref<8x128xf32, #tpu.memory_space<vmem>>, vector<8x128xf32>
    %59 = vector.extract_strided_slice %0 {offsets = [5, 0], sizes = [1, 128], strides = [1, 1]} : vector<8x128xf32> to vector<1x128xf32>
    %60 = vector.broadcast %59 : vector<1x128xf32> to vector<8x128xf32>
    %61 = arith.mulf %58, %60 : vector<8x128xf32>
    %cst_18 = arith.constant dense<0.000000e+00> : vector<8xf32>
    %62 = vector.multi_reduction <add>, %61, %cst_18 [1] : vector<8x128xf32> to vector<8xf32>
    %63 = vector.shape_cast %62 : vector<8xf32> to vector<8x1xf32>
    %c5_i32 = arith.constant 5 : i32
    %64 = vector.broadcast %c5_i32 : i32 to vector<8x8xi32>
    %65 = arith.cmpi eq, %1, %64 : vector<8x8xi32>
    %66 = vector.shape_cast %63 : vector<8x1xf32> to vector<8x1xf32>
    %67 = vector.broadcast %66 : vector<8x1xf32> to vector<8x8xf32>
    %68 = arith.select %65, %67, %57 : vector<8x8xi1>, vector<8x8xf32>
    %c0_19 = arith.constant 0 : index
    %c0_20 = arith.constant 0 : index
    %69 = vector.load %arg8[%c0_19, %c0_20] : memref<8x8xf32, #tpu.memory_space<vmem>>, vector<8x8xf32>
    tpu.vector_store %arg8[%c0_19, %c0_20], %68 {strides = array<i32>} : memref<8x8xf32, #tpu.memory_space<vmem>>, vector<8x8xf32>,
    return
  }
  func.func @transform_0(%arg0: i32) -> (i32, i32) {
    %c0_i32 = arith.constant 0 : i32
    %c0_i32_0 = arith.constant 0 : i32
    return %arg0, %c0_i32 : i32, i32
  }
  func.func @transform_1(%arg0: i32) -> (i32, i32) {
    %c0_i32 = arith.constant 0 : i32
    %c0_i32_0 = arith.constant 0 : i32
    return %arg0, %c0_i32 : i32, i32
  }
  func.func @transform_2(%arg0: i32) -> (i32, i32) {
    %c0_i32 = arith.constant 0 : i32
    %c0_i32_0 = arith.constant 0 : i32
    return %arg0, %c0_i32 : i32, i32
  }
  func.func @transform_3(%arg0: i32) -> (i32, i32) {
    %c0_i32 = arith.constant 0 : i32
    %c0_i32_0 = arith.constant 0 : i32
    return %arg0, %c0_i32 : i32, i32
  }
  func.func @transform_4(%arg0: i32) -> (i32, i32) {
    %c0_i32 = arith.constant 0 : i32
    %c0_i32_0 = arith.constant 0 : i32
    return %arg0, %c0_i32 : i32, i32
  }
  func.func @transform_5(%arg0: i32) -> (i32, i32) {
    %c0_i32 = arith.constant 0 : i32
    %c0_i32_0 = arith.constant 0 : i32
    return %arg0, %c0_i32 : i32, i32
  }
  func.func @transform_6(%arg0: i32) -> (i32, i32) {
    %c0_i32 = arith.constant 0 : i32
    %c0_i32_0 = arith.constant 0 : i32
    %c0_i32_1 = arith.constant 0 : i32
    return %c0_i32, %c0_i32_0 : i32, i32
  }
  func.func @transform_7(%arg0: i32) -> (i32, i32) {
    %c0_i32 = arith.constant 0 : i32
    %c0_i32_0 = arith.constant 0 : i32
    return %arg0, %c0_i32 : i32, i32
  }
}

</mosaic_0001>

<bundles_post_ra>
// kernel: tpu_custom_call.1
= control target key start
LH: loop header
LB: loop body
LE: loop exit
PB: predicated region body
PF: predicated region fallthrough
CT: control target
= control target key end

     0   :  { %s1368_s0 = inlined_call_operand.hbm [shape: f32[16,128], index: 0, kind: input, shape index: {}]   ;;  %s1369_s1 = inlined_call_operand.hbm [shape: f32[16,128], index: 1, kind: input, shape index: {}]   ;;  %s1370_s2 = inlined_call_operand.hbm [shape: f32[16,128], index: 2, kind: input, shape index: {}]   ;;  %s1371_s3 = inlined_call_operand.hbm [shape: f32[16,128], index: 3, kind: input, shape index: {}]   ;;  %s1372_s4 = inlined_call_operand.hbm [shape: f32[16,128], index: 4, kind: input, shape index: {}]   ;;  %s1373_s5 = inlined_call_operand.vmem [shape: f32[16,128], index: 5, kind: input, shape index: {}]   ;;  %s1374_s6 = inlined_call_operand.hbm [shape: f32[8,128], index: 6, kind: input, shape index: {}]   ;;  %s1375_s7 = inlined_call_operand.vmem [shape: f32[16,8], index: 7, kind: output, shape index: {}]  }
   0x1   :  { %1386 = sst [smem:[#allocation18_spill]] %s1368_s0 }
   0x2   :  { %1387 = sst [smem:[#allocation19_spill]] %s1369_s1 }
   0x3   :  { %1388 = sst [smem:[#allocation20_spill]] %s1371_s3 }
   0x4   :  { %12 = vsyncpa [#allocation3], 0 }
   0x5   :  { %14 = vsyncpa [#allocation3 + $0x1], 0 }
   0x6   :  { %15 = vsyncpa [#allocation5], 0 }
   0x7   :  { %17 = vsyncpa [#allocation5 + $0x1], 0 }
   0x8   :  { %18 = vsyncpa [#allocation8], 0 }
   0x9   :  { %20 = vsyncpa [#allocation8 + $0x1], 0 }
   0xa   :  { %21 = vsyncpa [#allocation11], 0  ;;  %s1071_s24 = smov 0   ;;  %s1073_s25 = smov 0  }
   0xb   :  { %s1075_s26 = smov 0   ;;  %s1077_s27 = smov 0  }
   0xc LB: > { %s1092_s28 = sadd.s32 1, %s1023_s27   ;;  %s34_s29 = sadd.s32 1, %s1019_s26  ;;  %s1023_s27 = sphi %s1077_s27, %s1409_s27   ;;  %s1019_s26 = sphi %s1075_s26, %s1413_s26   ;;  %s1015_s25 = sphi %s1073_s25, %s1412_s25   ;;  %s1011_s24 = sphi %s1071_s24, %s1411_s24  }
   0xd   : > { %1389 = sst [smem:[#allocation16_spill]] %s1092_s28  ;;  %s31_s30 = ssub.s32 %s1023_s27, %s1092_s28 }
   0xe   : > { %p41_p0 = scmp.ne.s32.totalorder %s1019_s26, %s1015_s25  ;;  %p32_p1 = scmp.eq.s32.totalorder %s31_s30, 0 }
   0xf   : > { %p42_p2 = scmp.eq.s32.totalorder %s1023_s27, 0  ;;  %p764_p3 = scmp.lt.s32.totalorder %s1023_s27, 2 }
  0x10   : > { %s1102_s8 = scalar_select %p32_p1, %s1019_s26, %s34_s29  }
  0x11   : > { %p43_p4 = por %p42_p2, %p41_p0  ;;  %s1376_s9 = sand.u32 1, %s1019_s26  }
  0x12   : > { %1390 = sst [smem:[#allocation17_spill]] %s1102_s8  ;;  %s1107_s10 = sshll.u32 %s1376_s9, 3 }
  0x13   : > { %s1110_s11 = sshll.u32 %s1023_s27, 7  ;;  %p1112_p5 = pnand %p764_p3, %p43_p4 }
  0x14   : > { %s277_s13 = sand.u32 1, %s1023_s27   ;;  %s1392_s1 = sld [smem:[#allocation19_spill]] }
  0x15   : > { %s1391_s12 = scalar_select %p1112_p5, 1, 0 }
  0x16   : > { %s281_s17 = scalar_lea.vmem [#allocation4], %s1107_s10  ;;  %s1128_s19 = scalar_lea.sflag [#allocation5], %s277_s13 }
  0x17   : > { %s288_s18 = sshll.u32 %s281_s17, 4  ;;  %p1134_p7 = pneg %p1112_p5  ;;  %s1124_s18 = int_to_ptr.vmem [resolvable:$true] %s288_s18 }
  0x19   : > { %s1393_s21 = scalar_select %p1134_p7, 1, 0 }
  0x1a   : > { %s1121_s16 = scalar_lea.hbm %s1392_s1, %s1110_s11  ;;  %s804_s29 = scalar_lea.hbm %s1392_s1, 256 }
  0x1b   : > { %s799_s20 = scalar_lea.hbm %s1121_s16, 128  ;;  %p805_p10 = scmp.lt.u32.totalorder %s1121_s16, %s1392_s1 }
  0x1c   : > { %p800_p6 = scmp.ne.s32.totalorder %s1121_s16, %s799_s20  ;;  %p806_p11 = scmp.lt.u32.totalorder %s804_s29, %s799_s20 }
  0x1d   : > { %p808_p13 = scmp.lt.u32.totalorder %s799_s20, %s1121_s16 }
  0x1e   : > { %p802_p8 = pnand %p1134_p7, %p800_p6  ;;  %p807_p12 = por %p806_p11, %p805_p10 }
  0x20   : > { %p803_p9 = pneg %p802_p8  ;;  %p809_p0 = por %p808_p13, %p807_p12 }
  0x22   : > { %p810_p1 = pnand %p809_p0, %p803_p9 }
  0x24   : > { %813 = shalt.err (!%p810_p1)
}
  0x25   : > { %s814_s15 = scalar_lea.vmem %s1124_s18, 128  ;;  %s1025_s17 = smov [#allocation4]  }
  0x26   : > { %p815_p2 = scmp.ne.s32.totalorder %s1124_s18, %s814_s15  ;;  %s819_s22 = sshll.u32 %s1025_s17, 4  ;;  %s820_s22 = int_to_ptr.vmem [resolvable:$false] %s819_s22 }
  0x27   : > { %s821_s23 = scalar_lea.vmem %s820_s22, 256  ;;  %p822_p6 = scmp.lt.s32.totalorder %s1124_s18, %s820_s22 }
  0x28   : > { %p817_p3 = pnand %p815_p2, %p1134_p7  ;;  %p823_p8 = scmp.lt.s32.totalorder %s821_s23, %s814_s15 }
  0x2a   : > { %p818_p4 = pneg %p817_p3  ;;  %p824_p10 = por %p823_p8, %p822_p6 }
  0x2c   : > { %p825_p11 = pnand %p824_p10, %p818_p4 }
  0x2e   : > { %828 = shalt.err (!%p825_p11)
}
  0x2f   : > { %753 = dma.hbm_to_vmem [thread:$0]  (!%p1112_p5), %s1121_s16, 128, %s1124_s18, %s1128_s19  }
  0x30   : > { %s1394_s3 = sld [smem:[#allocation20_spill]]  ;;  %s317_s14 = scalar_lea.vmem [#allocation7], %s1107_s10 }
  0x31   : > { %s324_s15 = sshll.u32 %s317_s14, 4  ;;  %s1167_s17 = scalar_lea.sflag [#allocation8], %s277_s13  ;;  %s325_s15 = int_to_ptr.vmem [resolvable:$true] %s324_s15 }
  0x36   : > { %s1162_s30 = scalar_lea.hbm %s1394_s3, %s1110_s11  ;;  %s834_s23 = scalar_lea.hbm %s1394_s3, 256 }
  0x37   : > { %s829_s22 = scalar_lea.hbm %s1162_s30, 128  ;;  %p835_p0 = scmp.lt.u32.totalorder %s1162_s30, %s1394_s3 }
  0x38   : > { %p830_p9 = scmp.ne.s32.totalorder %s1162_s30, %s829_s22  ;;  %p836_p1 = scmp.lt.u32.totalorder %s834_s23, %s829_s22 }
  0x39   : > { %p838_p3 = scmp.lt.u32.totalorder %s829_s22, %s1162_s30 }
  0x3a   : > { %p832_p12 = pnand %p830_p9, %p1134_p7  ;;  %p837_p2 = por %p836_p1, %p835_p0 }
  0x3c   : > { %p833_p13 = pneg %p832_p12  ;;  %p839_p4 = por %p838_p3, %p837_p2 }
  0x3e   : > { %p840_p6 = pnand %p839_p4, %p833_p13 }
  0x40   : > { %843 = shalt.err (!%p840_p6)
}
  0x41   : > { %s844_s13 = scalar_lea.vmem %s325_s15, 128  ;;  %s1026_s14 = smov [#allocation7]  }
  0x42   : > { %p845_p8 = scmp.ne.s32.totalorder %s325_s15, %s844_s13  ;;  %s849_s9 = sshll.u32 %s1026_s14, 4  ;;  %s850_s9 = int_to_ptr.vmem [resolvable:$false] %s849_s9 }
  0x43   : > { %s851_s16 = scalar_lea.vmem %s850_s9, 256  ;;  %p852_p9 = scmp.lt.s32.totalorder %s325_s15, %s850_s9 }
  0x44   : > { %p847_p10 = pnand %p845_p8, %p1134_p7  ;;  %p853_p12 = scmp.lt.s32.totalorder %s851_s16, %s844_s13 }
  0x46   : > { %p848_p11 = pneg %p847_p10  ;;  %p854_p5 = por %p853_p12, %p852_p9 }
  0x48   : > { %p855_p0 = pnand %p854_p5, %p848_p11 }
  0x4a   : > { %858 = shalt.err (!%p855_p0)
}
  0x4b   : > { %p1395_p1 = scmp.ne.s32.totalorder %s1391_s12, 0  ;;  %s1188_s22 = sadd.s32 4294967295, %s1023_s27  }
  0x4c   : > { %p47_p5 = scmp.ne.s32.totalorder %s1015_s25, %s1011_s24  ;;  %p1381_p13 = scmp.eq.s32.totalorder %s1188_s22, 0 }
  0x4d   : > { %759 = dma.hbm_to_vmem [thread:$0]  (!%p1395_p1), %s1162_s30, 128, %s325_s15, %s1167_s17  }
  0x4e   : > { %p705_p2 = scmp.ge.s32.totalorder %s1023_s27, 1  ;;  %p235_p3 = scmp.lt.s32.totalorder %s1023_s27, 3 }
  0x4f   : > { %p1197_p4 = por %p1381_p13, %p47_p5  ;;  %s1027_s30 = smov [#allocation10]  }
  0x50   : > { %p1201_p6 = pnand %p705_p2, %p235_p3  ;;  %s248_s15 = sshll.u32 %s1027_s30, 4  ;;  %s249_s15 = int_to_ptr.vmem [resolvable:$true] %s248_s15 }
  0x51   : > { %s1396_s9 = scalar_select %p1197_p4, 1, 0 }
  0x52   : > { %s1397_s18 = scalar_select %p1201_p6, 1, 0 }
  0x53   : > { %p743_p8 = pneg %p1201_p6  ;;  %s1398_s0 = sld [smem:[#allocation18_spill]] }
  0x54   : > { %s263_s29 = scalar_lea.vmem [#allocation2], %s1107_s10  ;;  %s1226_s30 = scalar_lea.hbm %s1370_s2, %s1110_s11 }
  0x55   : > { %p1215_p10 = pnand %p743_p8, %p1381_p13  ;;  %s270_s13 = sshll.u32 %s263_s29, 4  ;;  %s1220_s13 = int_to_ptr.vmem [resolvable:$true] %s270_s13 }
  0x56   : > { %s859_s23 = scalar_lea.hbm %s1374_s6, 128 }
  0x57   : > { %p860_p11 = scmp.ne.s32.totalorder %s1374_s6, %s859_s23  ;;  %p861_p9 = pneg %p1215_p10 }
  0x58   : > { %p866_p5 = scmp.lt.u32.totalorder %s859_s23, %s1374_s6 }
  0x59   : > { %s1211_s20 = scalar_lea.hbm %s1398_s0, %s1110_s11  ;;  %p862_p12 = pnand %p861_p9, %p860_p11 }
  0x5b   : > { %p863_p0 = pneg %p862_p12 }
  0x5d   : > { %p868_p2 = pnand %p866_p5, %p863_p0 }
  0x5f   : > { %871 = shalt.err (!%p868_p2)
}
  0x60   : > { %s872_s14 = scalar_lea.vmem %s249_s15, 128  ;;  %p880_p4 = scmp.lt.s32.totalorder %s249_s15, %s249_s15 }
  0x61   : > { %p873_p3 = scmp.ne.s32.totalorder %s249_s15, %s872_s14  ;;  %p881_p6 = scmp.lt.s32.totalorder %s872_s14, %s872_s14 }
  0x63   : > { %p875_p8 = pnand %p873_p3, %p861_p9  ;;  %p882_p1 = por %p881_p6, %p880_p4 }
  0x65   : > { %p876_p13 = pneg %p875_p8 }
  0x67   : > { %p883_p7 = pnand %p882_p1, %p876_p13 }
  0x69   : > { %886 = shalt.err (!%p883_p7)
}
  0x6a   : > { %746 = dma.hbm_to_vmem [thread:$0]  (!%p1215_p10), %s1374_s6, 128, %s249_s15, [#allocation11]  }
  0x6b   : > { %s1400_s28 = sand.u32 1, %s1019_s26   ;;  %s887_s16 = scalar_lea.hbm %s1211_s20, 128 }
  0x6c   : > { %s260_s8 = scalar_lea.sflag [#allocation3], %s1400_s28  ;;  %p888_p11 = scmp.ne.s32.totalorder %s1211_s20, %s887_s16 }
  0x6d   : > { %p1401_p9 = scmp.ne.s32.totalorder %s1393_s21, 0  ;;  %s892_s27 = scalar_lea.hbm %s1398_s0, 256 }
  0x6e   : > { %p893_p7 = scmp.lt.u32.totalorder %s1211_s20, %s1398_s0  ;;  %p894_p13 = scmp.lt.u32.totalorder %s892_s27, %s887_s16 }
  0x6f   : > { %p890_p4 = pnand %p888_p11, %p1401_p9  ;;  %p896_p12 = scmp.lt.u32.totalorder %s887_s16, %s1211_s20 }
  0x70   : > { %p895_p6 = por %p894_p13, %p893_p7 }
  0x71   : > { %p891_p1 = pneg %p890_p4 }
  0x72   : > { %p897_p0 = por %p896_p12, %p895_p6 }
  0x74   : > { %p898_p10 = pnand %p897_p0, %p891_p1 }
  0x76   : > { %901 = shalt.err (!%p898_p10)
}
  0x77   : > { %s902_s15 = scalar_lea.vmem %s1220_s13, 128  ;;  %s1028_s1 = smov [#allocation2]  }
  0x78   : > { %p903_p5 = scmp.ne.s32.totalorder %s1220_s13, %s902_s15  ;;  %s907_s3 = sshll.u32 %s1028_s1, 4  ;;  %s908_s3 = int_to_ptr.vmem [resolvable:$false] %s907_s3 }
  0x79   : > { %s909_s28 = scalar_lea.vmem %s908_s3, 256  ;;  %p910_p8 = scmp.lt.s32.totalorder %s1220_s13, %s908_s3 }
  0x7a   : > { %p905_p2 = pnand %p903_p5, %p1401_p9  ;;  %p911_p11 = scmp.lt.s32.totalorder %s909_s28, %s902_s15 }
  0x7c   : > { %p906_p3 = pneg %p905_p2  ;;  %p912_p4 = por %p911_p11, %p910_p8 }
  0x7e   : > { %p913_p7 = pnand %p912_p4, %p906_p3 }
  0x80   : > { %916 = shalt.err (!%p913_p7)
}
  0x81   : > { %p1402_p1 = scmp.ne.s32.totalorder %s1391_s12, 0  ;;  %s299_s16 = scalar_lea.vmem [#allocation6], %s1107_s10 }
  0x82   : > { %s306_s23 = sshll.u32 %s299_s16, 4  ;;  %s1272_s29 = scalar_lea.hbm %s1372_s4, %s1110_s11  ;;  %s307_s23 = int_to_ptr.vmem [resolvable:$true] %s306_s23 }
  0x83   : > { %750 = dma.hbm_to_vmem [thread:$0]  (!%p1402_p1), %s1211_s20, 128, %s1220_s13, %s260_s8  }
  0x84   : > { %s917_s14 = scalar_lea.hbm %s1226_s30, 128  ;;  %s922_s3 = scalar_lea.hbm %s1370_s2, 256 }
  0x85   : > { %p918_p13 = scmp.ne.s32.totalorder %s1226_s30, %s917_s14  ;;  %p923_p0 = scmp.lt.u32.totalorder %s1226_s30, %s1370_s2 }
  0x86   : > { %p924_p10 = scmp.lt.u32.totalorder %s922_s3, %s917_s14  ;;  %p926_p2 = scmp.lt.u32.totalorder %s917_s14, %s1226_s30 }
  0x87   : > { %p920_p6 = pnand %p918_p13, %p1401_p9 }
  0x88   : > { %p925_p5 = por %p924_p10, %p923_p0 }
  0x89   : > { %p921_p12 = pneg %p920_p6 }
  0x8a   : > { %p927_p3 = por %p926_p2, %p925_p5 }
  0x8c   : > { %p928_p8 = pnand %p927_p3, %p921_p12 }
  0x8e   : > { %931 = shalt.err (!%p928_p8)
}
  0x8f   : > { %s932_s11 = scalar_lea.vmem %s307_s23, 128  ;;  %s1029_s20 = smov [#allocation6]  }
  0x90   : > { %p933_p11 = scmp.ne.s32.totalorder %s307_s23, %s932_s11  ;;  %s937_s13 = sshll.u32 %s1029_s20, 4  ;;  %s938_s13 = int_to_ptr.vmem [resolvable:$false] %s937_s13 }
  0x91   : > { %s939_s8 = scalar_lea.vmem %s938_s13, 256  ;;  %p940_p13 = scmp.lt.s32.totalorder %s307_s23, %s938_s13 }
  0x92   : > { %p935_p4 = pnand %p933_p11, %p1401_p9  ;;  %p941_p6 = scmp.lt.s32.totalorder %s939_s8, %s932_s11 }
  0x94   : > { %p936_p7 = pneg %p935_p4  ;;  %p942_p1 = por %p941_p6, %p940_p13 }
  0x96   : > { %p943_p0 = pnand %p942_p1, %p936_p7 }
  0x98   : > { %946 = shalt.err (!%p943_p0)
}
  0x99   : > { %p1403_p10 = scmp.ne.s32.totalorder %s1391_s12, 0  ;;  %s335_s0 = scalar_lea.vmem [#allocation9], %s1107_s10 }
  0x9a   : > { %s342_s16 = sshll.u32 %s335_s0, 4  ;;  %s947_s24 = scalar_lea.hbm %s1272_s29, 128  ;;  %s343_s16 = int_to_ptr.vmem [resolvable:$true] %s342_s16 }
  0x9b   : > { %756 = dma.hbm_to_vmem [thread:$0]  (!%p1403_p10), %s1226_s30, 128, %s307_s23, %s1128_s19  }
  0x9c   : > { %p948_p12 = scmp.ne.s32.totalorder %s1272_s29, %s947_s24  ;;  %s952_s15 = scalar_lea.hbm %s1372_s4, 256 }
  0x9d   : > { %p953_p2 = scmp.lt.u32.totalorder %s1272_s29, %s1372_s4  ;;  %p954_p3 = scmp.lt.u32.totalorder %s952_s15, %s947_s24 }
  0x9e   : > { %p950_p5 = pnand %p948_p12, %p1401_p9  ;;  %p956_p11 = scmp.lt.u32.totalorder %s947_s24, %s1272_s29 }
  0x9f   : > { %p955_p8 = por %p954_p3, %p953_p2 }
  0xa0   : > { %p951_p1 = pneg %p950_p5 }
  0xa1   : > { %p957_p4 = por %p956_p11, %p955_p8 }
  0xa3   : > { %p958_p7 = pnand %p957_p4, %p951_p1 }
  0xa5   : > { %961 = shalt.err (!%p958_p7)
}
  0xa6   : > { %s962_s10 = scalar_lea.vmem %s343_s16, 128  ;;  %s1030_s19 = smov [#allocation9]  }
  0xa7   : > { %p963_p13 = scmp.ne.s32.totalorder %s343_s16, %s962_s10  ;;  %s967_s30 = sshll.u32 %s1030_s19, 4  ;;  %s968_s30 = int_to_ptr.vmem [resolvable:$false] %s967_s30 }
  0xa8   : > { %s969_s23 = scalar_lea.vmem %s968_s30, 256  ;;  %p970_p12 = scmp.lt.s32.totalorder %s343_s16, %s968_s30 }
  0xa9   : > { %p965_p6 = pnand %p963_p13, %p1401_p9  ;;  %p971_p5 = scmp.lt.s32.totalorder %s969_s23, %s962_s10 }
  0xab   : > { %p966_p0 = pneg %p965_p6  ;;  %p972_p10 = por %p971_p5, %p970_p12 }
  0xad   : > { %p973_p2 = pnand %p972_p10, %p966_p0 }
  0xaf   : > { %976 = shalt.err (!%p973_p2)
}
  0xb0   : > { %p1404_p3 = scmp.ne.s32.totalorder %s1391_s12, 0  ;;  %p1405_p1 = scmp.ne.s32.totalorder %s1397_s18, 0 }
  0xb1   : > { %s360_s21 = sand.u32 (!%p1405_p1), 1, %s1015_s25   ;;  %p1406_p9 = scmp.ne.s32.totalorder (!%p1405_p1), %s1396_s9, 0 }
  0xb2   : > { %762 = dma.hbm_to_vmem [thread:$0]  (!%p1404_p3), %s1272_s29, 128, %s343_s16, %s1167_s17  }
  0xb3   : > { %358 = sbr.rel (%p1405_p1) target bundleno = 359 (0x167), region = 48  ;;  %s1314_s28 = sshll.u32 (!%p1405_p1), %s360_s21, 3 }
  0xb4   : > { %s361_s11 = scalar_lea.sflag (!%p1405_p1), [#allocation3], %s360_s21  ;;  %s364_s20 = scalar_lea.vmem (!%p1405_p1), [#allocation2], %s1314_s28 }
  0xba   : > { %994 = dma.done.wait (%p1406_p9), %s361_s11, 128  }
  0xbb   : > { %996 = vsyncadd (%p1406_p9), %s361_s11, 4294967168  ;;  %s369_s12 = sand.u32 1, %s1188_s22   ;;  %s373_s18 = scalar_lea.vmem [#allocation4], %s1314_s28 }
  0xbc   : > { %s370_s17 = scalar_lea.sflag [#allocation5], %s369_s12 }
  0xbd   : > { %998 = dma.done.wait (%p1406_p9), %s370_s17, 256  }
  0xbe   : > { %1000 = vsyncadd (%p1406_p9), %s370_s17, 4294967040  ;;  %s382_s29 = scalar_lea.vmem [#allocation6], %s1314_s28  ;;  %s388_s13 = scalar_lea.sflag [#allocation8], %s369_s12 }
  0xbf   : > { %s391_s8 = scalar_lea.vmem [#allocation7], %s1314_s28 }
  0xc0   : > { %1002 = dma.done.wait (%p1406_p9), %s388_s13, 256  }
  0xc1   : > { %1004 = vsyncadd (%p1406_p9), %s388_s13, 4294967040  ;;  %s400_s0 = scalar_lea.vmem [#allocation9], %s1314_s28  ;;  %p1407_p10 = scmp.eq.s32.totalorder %s1188_s22, 0 }
  0xc3   : > { %1006 = dma.done.wait (%p1407_p10), [#allocation11], 128   ;;  %p1408_p8 = pmov %p1407_p10 }
  0xc4   : > { %v467_v0 = vlaneseq  ;;  %p458_p11 = scmp.lt.s32.totalorder %s1188_s22, 1  ;;  %v466_v6 = vld [vmem:[#allocation10] sm:$0xff]  ;;  %v469_v7 = vld [vmem:[%s364_s20] sm:$0xff]  ;;  %vm529_vm6 = vcmask 64512  }
  0xc5   : > { %1008 = vsyncadd (%p1408_p8), [#allocation11], 4294967168  ;;  %v489_v8 = vld [vmem:[%s382_s29] sm:$0xff]  ;;  %v479_v15 = vld [vmem:[%s373_s18] sm:$0xff] }
  0xc6   : > { %v471_v1 = vshrl.u32 %v467_v0, 7  ;;  %s1415_s22 = smov (!%p458_p11, %s1188_s22), 1  ;;  %v499_v16 = vld [vmem:[%s391_s8] sm:$0xff]  ;;  %v509_v23 = vld [vmem:[%s400_s0] sm:$0xff]  ;;  %v468_v27 = vand.u32 127, %v467_v0 }
  0xc7   : > { %s725_s9 = sshll.u32 %s1415_s22, 3 }
  0xc8   : > { %v472_v2 = vsub.s32 0, %v471_v1  ;;  %v492_v3 = vsub.s32 2, %v471_v1  ;;  %v482_v4 = vsub.s32 1, %v471_v1  ;;  %v502_v5 = vsub.s32 3, %v471_v1  ;;  %s461_s27 = scalar_lea.vmem %s1373_s5, %s725_s9  ;;  %s465_s1 = scalar_lea.vmem %s1375_s7, %s725_s9 }
  0xc9   : > { %v512_v9 = vsub.s32 4, %v471_v1  ;;  %v522_v10 = vsub.s32 5, %v471_v1  ;;  %v519_v24 = vld [vmem:[%s461_s27] sm:$0xff]  ;;  %vm477_vm0 = vcmp.eq.s32.totalorder %v468_v27, 0  ;;  %vm487_vm1 = vcmp.eq.s32.totalorder %v468_v27, 1 }
  0xca   : > { %v473_v11 = vrot.slane %v466_v6, %v472_v2  ;;  %v493_v12 = vrot.slane %v466_v6, %v492_v3  ;;  %v483_v13 = vrot.slane %v466_v6, %v482_v4  ;;  %v503_v14 = vrot.slane %v466_v6, %v502_v5 }
  0xcb   : > { %v513_v19 = vrot.slane %v466_v6, %v512_v9  ;;  %v523_v22 = vrot.slane %v466_v6, %v522_v10  ;;  %vm497_vm2 = vcmp.eq.s32.totalorder %v468_v27, 2  ;;  %vm507_vm3 = vcmp.eq.s32.totalorder %v468_v27, 3 }
  0xcc   : > { %v474_v17 = vmul.f32 %v473_v11, %v469_v7  ;;  %v494_v18 = vmul.f32 %v493_v12, %v489_v8  ;;  %v484_v20 = vmul.f32 %v483_v13, %v479_v15  ;;  %v504_v21 = vmul.f32 %v503_v14, %v499_v16 }
  0xcd   : > { %v514_v25 = vmul.f32 %v513_v19, %v509_v23  ;;  %v524_v26 = vmul.f32 %v523_v22, %v519_v24  ;;  %vm517_vm4 = vcmp.eq.s32.totalorder %v468_v27, 4  ;;  %vm527_vm5 = vcmp.eq.s32.totalorder %v468_v27, 5 }
  0xce   : > { %475 = vadd.xlane.f32.xlu0 %v474_v17  ;;  %495 = vadd.xlane.f32.xlu1 %v494_v18 }
  0xd2   : > { %485 = vadd.xlane.f32.xlu0 %v484_v20  ;;  %505 = vadd.xlane.f32.xlu1 %v504_v21 }
  0xd6   : > { %515 = vadd.xlane.f32.xlu0 %v514_v25  ;;  %525 = vadd.xlane.f32.xlu1 %v524_v26 }
 0x15b   : > { %v476_v28 = vpop.xlane.xlu0 %475  ;;  %v496_v29 = vpop.xlane.xlu1 %495 }
 0x15c   : > { %v478_v30 = vsel %vm477_vm0, %v476_v28, 0.0 }
 0x15f   : > { %v486_v31 = vpop.xlane.xlu0 %485  ;;  %v506_v32 = vpop.xlane.xlu1 %505 }
 0x160   : > { %v488_v33 = vsel %vm487_vm1, %v486_v31, %v478_v30 }
 0x161   : > { %v498_v34 = vsel %vm497_vm2, %v496_v29, %v488_v33 }
 0x162   : > { %v508_v35 = vsel %vm507_vm3, %v506_v32, %v498_v34 }
 0x163   : > { %v516_v36 = vpop.xlane.xlu0 %515  ;;  %v526_v37 = vpop.xlane.xlu1 %525 }
 0x164   : > { %v518_v38 = vsel %vm517_vm4, %v516_v36, %v508_v35 }
 0x165   : > { %v528_v39 = vsel %vm527_vm5, %v526_v37, %v518_v38 }
 0x166   : > { %530 = vst.msk [vmem:[%s465_s1] sm:$0xff] %vm529_vm6, %v528_v39 }
 0x167 PF: > { %s1409_s27 = sld [smem:[#allocation16_spill]]  ;;  %s1410_s3 = sld [smem:[#allocation17_spill]] }
 0x168   : > { %s1411_s24 = smov %s1015_s25  ;;  %s1412_s25 = smov %s1019_s26 }
 0x16d   : > { %p24_p4 = scmp.ge.s32.totalorder %s1409_s27, 4   ;;  %s1413_s26 = smov %s1410_s3 }
 0x16f   :  { %26 = sbr.rel (!%p24_p4) target bundleno = 12 (0xc), region = 143 }
 0x176   :  { %550 = vsyncpa [#allocation3], 1 }
 0x177   :  { %552 = vsyncpa [#allocation3 + $0x1], 1 }
 0x178   :  { %553 = vsyncpa [#allocation5], 1 }
 0x179   :  { %555 = vsyncpa [#allocation5 + $0x1], 1 }
 0x17a   :  { %556 = vsyncpa [#allocation8], 1 }
 0x17b   :  { %558 = vsyncpa [#allocation8 + $0x1], 1 }
 0x17c   :  { %559 = vsyncpa [#allocation11], 1 }

</bundles_post_ra>
